<compile_context>
chip_gen: v7x
topology: tpu7x:2x2x1
jax: 0.10.0
libtpu: 0.0.40
codegen_flags: <defaults>
</compile_context>

<pallas_src>
import jax
import jax.numpy as jnp
from jax.experimental import pallas as pl
from jax.experimental.pallas import tpu as pltpu

LN_EPS = 1e-5


def se_kernel(x_ref, g_ref, b_ref, w1_ref, b1_ref, w2_ref, b2_ref, o_ref):
    # x_ref: (block_b, N, C) tile of the token sequence, native dtype.
    x = x_ref[...]

    # Mean over tokens (PyTorch dim=1), accumulated in f32.
    a = jnp.mean(x, axis=1, dtype=jnp.float32)          # (block_b, C)

    # LayerNorm over channels (biased variance, like torch.nn.LayerNorm).
    mu = jnp.mean(a, axis=-1, keepdims=True)
    var = jnp.mean((a - mu) * (a - mu), axis=-1, keepdims=True)
    a_n = (a - mu) * jax.lax.rsqrt(var + LN_EPS)
    a_n = a_n * g_ref[...].astype(jnp.float32) + b_ref[...].astype(jnp.float32)

    # Linear -> ReLU : (block_b, C) @ (C, H)
    h = jnp.dot(a_n, w1_ref[...].astype(jnp.float32),
                preferred_element_type=jnp.float32)
    h = jnp.maximum(h + b1_ref[...].astype(jnp.float32), 0.0)

    # Linear -> Tanh : (block_b, H) @ (H, C)
    s = jnp.dot(h, w2_ref[...].astype(jnp.float32),
                preferred_element_type=jnp.float32)
    s = jnp.tanh(s + b2_ref[...].astype(jnp.float32))   # (block_b, C)

    # Gate the tokens: (block_b, 1, C) * (block_b, N, C), in the input dtype.
    o_ref[...] = (x * s[:, None, :].astype(x.dtype)).astype(o_ref.dtype)


def se_forward(x, gamma, beta, w1, b1, w2, b2, *, block_b=None,
               vmem_limit_bytes=48 * 1024 * 1024):
    B, N, C = x.shape
    H = w1.shape[1]
    itemsize = x.dtype.itemsize

    if block_b is None:
        # in + out tiles, double-buffered => ~4 live copies of the tile.
        # Keep that working set under ~24 MiB (fits v7x's 64 MiB VMEM with
        # plenty of headroom; v5e/v6e have 128 MiB physical).
        tile_budget = 24 * 1024 * 1024
        per_batch = max(1, N * C * itemsize)
        block_b = max(1, min(B, tile_budget // (4 * per_batch)))
        if B >= 2:
            # Keep >= 2 grid steps so megacore / v7x's 2 TensorCores both get
            # work under dimension_semantics=("parallel",).
            block_b = min(block_b, (B + 1) // 2)
    # Require an even split of the batch (exact outputs, simple index math).
    while B % block_b:
        block_b -= 1
    grid = (B // block_b,)

    const = lambda i: (0, 0)  # weights/biases: same block every grid step

    weight_bytes = sum(a.size * a.dtype.itemsize
                       for a in (gamma, beta, w1, b1, w2, b2))
    cost = pl.CostEstimate(
        flops=4 * B * C * H + B * N * C,        # two FCs + gating multiply
        transcendentals=B * C,                  # tanh
        bytes_accessed=2 * B * N * C * itemsize + weight_bytes,  # mem-bound
    )

    return pl.pallas_call(
        se_kernel,
        out_shape=jax.ShapeDtypeStruct((B, N, C), x.dtype),
        grid_spec=pltpu.PrefetchScalarGridSpec(
            num_scalar_prefetch=0,
            grid=grid,
            in_specs=[
                pl.BlockSpec((block_b, N, C), lambda i: (i, 0, 0)),  # x tile
                pl.BlockSpec((1, C), const),    # LN gamma
                pl.BlockSpec((1, C), const),    # LN beta
                pl.BlockSpec((C, H), const),    # fc1 weight
                pl.BlockSpec((1, H), const),    # fc1 bias
                pl.BlockSpec((H, C), const),    # fc2 weight
                pl.BlockSpec((1, C), const),    # fc2 bias
            ],
            out_specs=pl.BlockSpec((block_b, N, C), lambda i: (i, 0, 0)),
        ),
        compiler_params=pltpu.CompilerParams(
            dimension_semantics=("parallel",),
            vmem_limit_bytes=vmem_limit_bytes,
        ),
        cost_estimate=cost,
    )(x, gamma, beta, w1, b1, w2, b2)


def se_reference(x, gamma, beta, w1, b1, w2, b2):
    # pure-JAX reference for correctness checking
    a = jnp.mean(x.astype(jnp.float32), axis=1, keepdims=True)   # (B,1,C)
    mu = jnp.mean(a, axis=-1, keepdims=True)
    var = jnp.mean((a - mu) ** 2, axis=-1, keepdims=True)
    a = (a - mu) / jnp.sqrt(var + LN_EPS) * gamma[0] + beta[0]
    h = jnp.maximum(a @ w1 + b1[0], 0.0)
    s = jnp.tanh(h @ w2 + b2[0])
    return s.astype(x.dtype) * x


if __name__ == "__main__":
    B, N, C = 8, 16, 128        # batch, tokens, channels (C % 128 == 0 -> lane-dense stores)
    hidden_ratio = 1
    H = int(C * hidden_ratio)   # hidden_dim

    key = jax.random.PRNGKey(0)
    kx, k1, k2, k3, k4 = jax.random.split(key, 5)

    x = jax.random.normal(kx, (B, N, C), dtype=jnp.float32)

    # deterministic parameter init (LayerNorm: ones/zeros; Linears: small normals)
    gamma = jnp.ones((1, C), jnp.float32)
    beta = jnp.zeros((1, C), jnp.float32)
    w1 = jax.random.normal(k1, (C, H), jnp.float32) * 0.1
    b1 = jax.random.normal(k2, (1, H), jnp.float32) * 0.1
    w2 = jax.random.normal(k3, (H, C), jnp.float32) * 0.1
    b2 = jax.random.normal(k4, (1, C), jnp.float32) * 0.1

    out = se_forward(x, gamma, beta, w1, b1, w2, b2)
    out = jax.block_until_ready(out)

    ref = se_reference(x, gamma, beta, w1, b1, w2, b2)
    assert out.shape == (B, N, C)
    max_diff = jnp.max(jnp.abs(out - ref))
    assert jnp.allclose(out, ref, atol=1e-4, rtol=1e-4), (
        f"mismatch vs reference (max abs diff = {max_diff})")

    print("KERNEL_OK")
</pallas_src>

<mosaic_0001>
module attributes {stable_mosaic.version = 11 : i64} {
  func.func @se_kernel(%arg0: i32, %arg1: memref<4x16x128xf32, #tpu.memory_space<vmem>>, %arg2: memref<1x128xf32, #tpu.memory_space<vmem>>, %arg3: memref<1x128xf32, #tpu.memory_space<vmem>>, %arg4: memref<128x128xf32, #tpu.memory_space<vmem>>, %arg5: memref<1x128xf32, #tpu.memory_space<vmem>>, %arg6: memref<128x128xf32, #tpu.memory_space<vmem>>, %arg7: memref<1x128xf32, #tpu.memory_space<vmem>>, %arg8: memref<4x16x128xf32, #tpu.memory_space<vmem>>) attributes {dimension_semantics = [#tpu.dimension_semantics<parallel>], iteration_bounds = array<i64: 2>, scalar_prefetch = 0 : i64, scratch_operands = 0 : i64, tpu.core_type = #tpu.core_type<tc>, window_params = [{transform_indices = @transform_0, window_bounds = array<i64: 4, 16, 128>}, {pipeline_mode = #tpu.pipeline_mode<synchronous>, transform_indices = @transform_1, window_bounds = array<i64: 1, 128>}, {pipeline_mode = #tpu.pipeline_mode<synchronous>, transform_indices = @transform_2, window_bounds = array<i64: 1, 128>}, {pipeline_mode = #tpu.pipeline_mode<synchronous>, transform_indices = @transform_3, window_bounds = array<i64: 128, 128>}, {pipeline_mode = #tpu.pipeline_mode<synchronous>, transform_indices = @transform_4, window_bounds = array<i64: 1, 128>}, {pipeline_mode = #tpu.pipeline_mode<synchronous>, transform_indices = @transform_5, window_bounds = array<i64: 128, 128>}, {pipeline_mode = #tpu.pipeline_mode<synchronous>, transform_indices = @transform_6, window_bounds = array<i64: 1, 128>}, {transform_indices = @transform_7, window_bounds = array<i64: 4, 16, 128>}]} {
    %c0 = arith.constant 0 : index
    %c0_0 = arith.constant 0 : index
    %c0_1 = arith.constant 0 : index
    %0 = vector.load %arg1[%c0, %c0_0, %c0_1] : memref<4x16x128xf32, #tpu.memory_space<vmem>>, vector<4x16x128xf32>
    %cst = arith.constant dense<0.000000e+00> : vector<4x128xf32>
    %1 = vector.multi_reduction <add>, %0, %cst [1] : vector<4x16x128xf32> to vector<4x128xf32>
    %cst_2 = arith.constant 1.600000e+01 : f32
    %2 = vector.broadcast %cst_2 : f32 to vector<4x128xf32>
    %3 = arith.divf %1, %2 : vector<4x128xf32>
    %cst_3 = arith.constant dense<0.000000e+00> : vector<4xf32>
    %4 = vector.multi_reduction <add>, %3, %cst_3 [1] : vector<4x128xf32> to vector<4xf32>
    %5 = vector.shape_cast %4 : vector<4xf32> to vector<4x1xf32>
    %cst_4 = arith.constant 1.280000e+02 : f32
    %6 = vector.broadcast %cst_4 : f32 to vector<4x1xf32>
    %7 = arith.divf %5, %6 : vector<4x1xf32>
    %8 = vector.broadcast %7 : vector<4x1xf32> to vector<4x128xf32>
    %9 = arith.subf %3, %8 : vector<4x128xf32>
    %10 = vector.broadcast %7 : vector<4x1xf32> to vector<4x128xf32>
    %11 = arith.subf %3, %10 : vector<4x128xf32>
    %12 = arith.mulf %9, %11 : vector<4x128xf32>
    %cst_5 = arith.constant dense<0.000000e+00> : vector<4xf32>
    %13 = vector.multi_reduction <add>, %12, %cst_5 [1] : vector<4x128xf32> to vector<4xf32>
    %14 = vector.shape_cast %13 : vector<4xf32> to vector<4x1xf32>
    %cst_6 = arith.constant 1.280000e+02 : f32
    %15 = vector.broadcast %cst_6 : f32 to vector<4x1xf32>
    %16 = arith.divf %14, %15 : vector<4x1xf32>
    %17 = vector.broadcast %7 : vector<4x1xf32> to vector<4x128xf32>
    %18 = arith.subf %3, %17 : vector<4x128xf32>
    %cst_7 = arith.constant 9.99999974E-6 : f32
    %19 = vector.broadcast %cst_7 : f32 to vector<4x1xf32>
    %20 = arith.addf %16, %19 : vector<4x1xf32>
    %21 = math.rsqrt %20 : vector<4x1xf32>
    %22 = vector.broadcast %21 : vector<4x1xf32> to vector<4x128xf32>
    %23 = arith.mulf %18, %22 : vector<4x128xf32>
    %c0_8 = arith.constant 0 : index
    %c0_9 = arith.constant 0 : index
    %24 = vector.load %arg2[%c0_8, %c0_9] : memref<1x128xf32, #tpu.memory_space<vmem>>, vector<1x128xf32>
    %25 = vector.broadcast %24 : vector<1x128xf32> to vector<4x128xf32>
    %26 = arith.mulf %23, %25 : vector<4x128xf32>
    %c0_10 = arith.constant 0 : index
    %c0_11 = arith.constant 0 : index
    %27 = vector.load %arg3[%c0_10, %c0_11] : memref<1x128xf32, #tpu.memory_space<vmem>>, vector<1x128xf32>
    %28 = vector.broadcast %27 : vector<1x128xf32> to vector<4x128xf32>
    %29 = arith.addf %26, %28 : vector<4x128xf32>
    %c0_12 = arith.constant 0 : index
    %c0_13 = arith.constant 0 : index
    %30 = vector.load %arg4[%c0_12, %c0_13] : memref<128x128xf32, #tpu.memory_space<vmem>>, vector<128x128xf32>
    %cst_14 = arith.constant dense<0.000000e+00> : vector<4x128xf32>
    %31 = tpu.matmul %29, %30, %cst_14 {dimension_numbers = #tpu.dot_dimension_numbers<[1], [0], [0], [1], [0, 0, 1, 1], [], []>} : vector<4x128xf32>, vector<128x128xf32>, vector<4x128xf32> -> vector<4x128xf32>
    %c0_15 = arith.constant 0 : index
    %c0_16 = arith.constant 0 : index
    %32 = vector.load %arg5[%c0_15, %c0_16] : memref<1x128xf32, #tpu.memory_space<vmem>>, vector<1x128xf32>
    %33 = vector.broadcast %32 : vector<1x128xf32> to vector<4x128xf32>
    %34 = arith.addf %31, %33 : vector<4x128xf32>
    %cst_17 = arith.constant 0.000000e+00 : f32
    %35 = vector.broadcast %cst_17 : f32 to vector<4x128xf32>
    %36 = arith.maximumf %34, %35 : vector<4x128xf32>
    %c0_18 = arith.constant 0 : index
    %c0_19 = arith.constant 0 : index
    %37 = vector.load %arg6[%c0_18, %c0_19] : memref<128x128xf32, #tpu.memory_space<vmem>>, vector<128x128xf32>
    %cst_20 = arith.constant dense<0.000000e+00> : vector<4x128xf32>
    %38 = tpu.matmul %36, %37, %cst_20 {dimension_numbers = #tpu.dot_dimension_numbers<[1], [0], [0], [1], [0, 0, 1, 1], [], []>} : vector<4x128xf32>, vector<128x128xf32>, vector<4x128xf32> -> vector<4x128xf32>
    %c0_21 = arith.constant 0 : index
    %c0_22 = arith.constant 0 : index
    %39 = vector.load %arg7[%c0_21, %c0_22] : memref<1x128xf32, #tpu.memory_space<vmem>>, vector<1x128xf32>
    %40 = vector.broadcast %39 : vector<1x128xf32> to vector<4x128xf32>
    %41 = arith.addf %38, %40 : vector<4x128xf32>
    %42 = math.tanh %41 : vector<4x128xf32>
    %43 = vector.shape_cast %42 : vector<4x128xf32> to vector<4x1x128xf32>
    %44 = vector.broadcast %43 : vector<4x1x128xf32> to vector<4x16x128xf32>
    %45 = arith.mulf %0, %44 : vector<4x16x128xf32>
    %c0_23 = arith.constant 0 : index
    %c0_24 = arith.constant 0 : index
    %c0_25 = arith.constant 0 : index
    %46 = vector.load %arg8[%c0_23, %c0_24, %c0_25] : memref<4x16x128xf32, #tpu.memory_space<vmem>>, vector<4x16x128xf32>
    tpu.vector_store %arg8[%c0_23, %c0_24, %c0_25], %45 {strides = array<i32>} : memref<4x16x128xf32, #tpu.memory_space<vmem>>, vector<4x16x128xf32>,
    return
  }
  func.func @transform_0(%arg0: i32) -> (i32, i32, i32) {
    %c0_i32 = arith.constant 0 : i32
    %c0_i32_0 = arith.constant 0 : i32
    %c0_i32_1 = arith.constant 0 : i32
    return %arg0, %c0_i32, %c0_i32_0 : i32, i32, i32
  }
  func.func @transform_1(%arg0: i32) -> (i32, i32) {
    %c0_i32 = arith.constant 0 : i32
    %c0_i32_0 = arith.constant 0 : i32
    %c0_i32_1 = arith.constant 0 : i32
    return %c0_i32, %c0_i32_0 : i32, i32
  }
  func.func @transform_2(%arg0: i32) -> (i32, i32) {
    %c0_i32 = arith.constant 0 : i32
    %c0_i32_0 = arith.constant 0 : i32
    %c0_i32_1 = arith.constant 0 : i32
    return %c0_i32, %c0_i32_0 : i32, i32
  }
  func.func @transform_3(%arg0: i32) -> (i32, i32) {
    %c0_i32 = arith.constant 0 : i32
    %c0_i32_0 = arith.constant 0 : i32
    %c0_i32_1 = arith.constant 0 : i32
    return %c0_i32, %c0_i32_0 : i32, i32
  }
  func.func @transform_4(%arg0: i32) -> (i32, i32) {
    %c0_i32 = arith.constant 0 : i32
    %c0_i32_0 = arith.constant 0 : i32
    %c0_i32_1 = arith.constant 0 : i32
    return %c0_i32, %c0_i32_0 : i32, i32
  }
  func.func @transform_5(%arg0: i32) -> (i32, i32) {
    %c0_i32 = arith.constant 0 : i32
    %c0_i32_0 = arith.constant 0 : i32
    %c0_i32_1 = arith.constant 0 : i32
    return %c0_i32, %c0_i32_0 : i32, i32
  }
  func.func @transform_6(%arg0: i32) -> (i32, i32) {
    %c0_i32 = arith.constant 0 : i32
    %c0_i32_0 = arith.constant 0 : i32
    %c0_i32_1 = arith.constant 0 : i32
    return %c0_i32, %c0_i32_0 : i32, i32
  }
  func.func @transform_7(%arg0: i32) -> (i32, i32, i32) {
    %c0_i32 = arith.constant 0 : i32
    %c0_i32_0 = arith.constant 0 : i32
    %c0_i32_1 = arith.constant 0 : i32
    return %arg0, %c0_i32, %c0_i32_0 : i32, i32, i32
  }
}

</mosaic_0001>

<bundles_post_ra>
// kernel: tpu_custom_call.1
= control target key start
LH: loop header
LB: loop body
LE: loop exit
PB: predicated region body
PF: predicated region fallthrough
CT: control target
= control target key end

     0   :  { %12 = vsyncpa [#allocation3], 0  ;;  %s1628_s0 = inlined_call_operand.hbm [shape: f32[8,16,128], index: 0, kind: input, shape index: {}]   ;;  %s1629_s1 = inlined_call_operand.vmem [shape: f32[1,128], index: 1, kind: input, shape index: {}]   ;;  %s1630_s2 = inlined_call_operand.vmem [shape: f32[1,128], index: 2, kind: input, shape index: {}]   ;;  %s1631_s3 = inlined_call_operand.hbm [shape: f32[128,128], index: 3, kind: input, shape index: {}]   ;;  %s1632_s4 = inlined_call_operand.vmem [shape: f32[1,128], index: 4, kind: input, shape index: {}]   ;;  %s1633_s5 = inlined_call_operand.hbm [shape: f32[128,128], index: 5, kind: input, shape index: {}]   ;;  %s1634_s6 = inlined_call_operand.vmem [shape: f32[1,128], index: 6, kind: input, shape index: {}]   ;;  %s1635_s7 = inlined_call_operand.hbm [shape: f32[8,16,128], index: 7, kind: output, shape index: {}]  }
   0x1   :  { %14 = vsyncpa [#allocation3 + $0x1], 0 }
   0x2   :  { %15 = vsyncpa [#allocation6], 0 }
   0x3   :  { %16 = vsyncpa [#allocation4], 0 }
   0x4   :  { %18 = vsyncpa [#allocation4 + $0x1], 0  ;;  %s1290_s24 = smov 0   ;;  %s1292_s25 = smov 0  }
   0x5   :  { %s1294_s26 = smov 0   ;;  %s1296_s27 = smov 0  }
   0x6 LB: > { %s1311_s28 = sadd.s32 4294967295, %s1236_s27   ;;  %s821_s29 = sadd.s32 4294967294, %s1236_s27   ;;  %s1236_s27 = sphi %s1296_s27, %s1657_s27   ;;  %s1232_s26 = sphi %s1294_s26, %s1656_s26   ;;  %s1228_s25 = sphi %s1292_s25, %s1655_s25   ;;  %s1224_s24 = sphi %s1290_s24, %s1654_s24  }
   0x7   : > { %p44_p0 = scmp.ne.s32.totalorder %s1228_s25, %s1224_s24  ;;  %p1636_p1 = scmp.eq.s32.totalorder %s1311_s28, 0 }
   0x8   : > { %p200_p3 = scmp.eq.s32.totalorder %s821_s29, 1  ;;  %p822_p5 = scmp.ge.s32.totalorder %s1236_s27, 1 }
   0x9   : > { %p1320_p4 = por %p1636_p1, %p44_p0  ;;  %p207_p7 = scmp.lt.s32.totalorder %s1236_s27, 3 }
   0xa   : > { %p1325_p6 = por %p200_p3, %p44_p0  ;;  %s1238_s10 = smov [#allocation5]  }
   0xb   : > { %s1640_s30 = scalar_select %p1320_p4, 1, 0 }
   0xc   : > { %s1641_s8 = scalar_select %p1325_p6, 1, 0 }
   0xd   : > { %p1330_p8 = pnand %p822_p5, %p207_p7  ;;  %s225_s11 = sshll.u32 %s1238_s10, 4  ;;  %s1334_s11 = int_to_ptr.vmem [resolvable:$true] %s225_s11 }
   0xe   : > { %s1239_s13 = smov [#allocation7]   ;;  %s1080_s17 = scalar_lea.hbm %s1631_s3, 2048 }
   0xf   : > { %p1013_p9 = pneg %p1330_p8  ;;  %s241_s14 = sshll.u32 %s1239_s13, 4  ;;  %s1345_s14 = int_to_ptr.vmem [resolvable:$true] %s241_s14 }
  0x10   : > { %p1081_p12 = scmp.ne.s32.totalorder %s1631_s3, %s1080_s17  ;;  %p1087_p5 = scmp.lt.u32.totalorder %s1080_s17, %s1631_s3 }
  0x11   : > { %p1341_p11 = pnand %p1013_p9, %p1636_p1 }
  0x13   : > { %p1082_p13 = pneg %p1341_p11 }
  0x15   : > { %p1083_p0 = pnand %p1082_p13, %p1081_p12 }
  0x17   : > { %p1084_p3 = pneg %p1083_p0 }
  0x19   : > { %p1089_p7 = pnand %p1087_p5, %p1084_p3 }
  0x1b   : > { %1092 = shalt.err (!%p1089_p7)
}
  0x1c   : > { %s1093_s22 = scalar_lea.vmem %s1334_s11, 2048  ;;  %p1101_p2 = scmp.lt.s32.totalorder %s1334_s11, %s1334_s11 }
  0x1d   : > { %p1094_p9 = scmp.ne.s32.totalorder %s1334_s11, %s1093_s22  ;;  %p1102_p12 = scmp.lt.s32.totalorder %s1093_s22, %s1093_s22 }
  0x1f   : > { %p1096_p10 = pnand %p1094_p9, %p1082_p13  ;;  %p1103_p0 = por %p1102_p12, %p1101_p2 }
  0x21   : > { %p1097_p1 = pneg %p1096_p10 }
  0x23   : > { %p1104_p6 = pnand %p1103_p0, %p1097_p1 }
  0x25   : > { %1107 = shalt.err (!%p1104_p6)
}
  0x26   : > { %s1637_s23 = smov 128   ;;  %s1241_s29 = smov 8  }
  0x27   : > { %1016 = dma.hbm_to_vmem [thread:$0]  (!%p1341_p11), %s1631_s3, 2048, %s1334_s11, [#allocation6], %s1637_s23, %s1637_s23, %s1241_s29  }
  0x28   : > { %s1108_s17 = scalar_lea.hbm %s1633_s5, 2048 }
  0x29   : > { %p1109_p1 = scmp.ne.s32.totalorder %s1633_s5, %s1108_s17  ;;  %p1115_p10 = scmp.lt.u32.totalorder %s1108_s17, %s1633_s5 }
  0x2b   : > { %p1111_p2 = pnand %p1109_p1, %p1082_p13 }
  0x2d   : > { %p1112_p6 = pneg %p1111_p2 }
  0x2f   : > { %p1117_p3 = pnand %p1115_p10, %p1112_p6 }
  0x31   : > { %1120 = shalt.err (!%p1117_p3)
}
  0x32   : > { %s1121_s11 = scalar_lea.vmem %s1345_s14, 2048  ;;  %p1129_p12 = scmp.lt.s32.totalorder %s1345_s14, %s1345_s14 }
  0x33   : > { %p1122_p5 = scmp.ne.s32.totalorder %s1345_s14, %s1121_s11  ;;  %p1130_p0 = scmp.lt.s32.totalorder %s1121_s11, %s1121_s11 }
  0x35   : > { %p1124_p7 = pnand %p1122_p5, %p1082_p13  ;;  %p1131_p1 = por %p1130_p0, %p1129_p12 }
  0x37   : > { %p1125_p9 = pneg %p1124_p7 }
  0x39   : > { %p1132_p2 = pnand %p1131_p1, %p1125_p9 }
  0x3b   : > { %1135 = shalt.err (!%p1132_p2)
}
  0x3c   : > { %1019 = dma.hbm_to_vmem [thread:$0]  (!%p1341_p11), %s1633_s5, 2048, %s1345_s14, [#allocation6], %s1637_s23, %s1637_s23, %s1241_s29  }
  0x3d   : > { %s1406_s12 = sadd.s32 1, %s1236_s27   ;;  %s31_s13 = sadd.s32 1, %s1232_s26 }
  0x3e   : > { %s28_s15 = ssub.s32 %s1236_s27, %s1406_s12  ;;  %p38_p13 = scmp.ne.s32.totalorder %s1232_s26, %s1228_s25 }
  0x3f   : > { %p29_p6 = scmp.eq.s32.totalorder %s28_s15, 0  ;;  %p39_p10 = scmp.eq.s32.totalorder %s1236_s27, 0 }
  0x40   : > { %p1644_p3 = scmp.eq.s32.totalorder %s1311_s28, 1  ;;  %p1030_p7 = scmp.lt.s32.totalorder %s1236_s27, 2 }
  0x41   : > { %s1422_s17 = scalar_select %p29_p6, %s1232_s26, %s31_s13  }
  0x42   : > { %p1416_p5 = por %p1644_p3, %p38_p13  ;;  %p40_p9 = por %p39_p10, %p38_p13 }
  0x43   : > { %s258_s18 = sand.u32 1, %s1232_s26   ;;  %s846_s14 = sshll.u32 %s1236_s27, 10 }
  0x44   : > { %s1645_s16 = scalar_select %p1416_p5, 1, 0 }
  0x45   : > { %s826_s19 = sshll.u32 %s258_s18, 6  ;;  %s1429_s11 = scalar_lea.hbm %s1628_s0, %s846_s14 }
  0x46   : > { %s262_s22 = scalar_lea.vmem [#allocation2], %s826_s19  ;;  %p1433_p11 = pnand %p1030_p7, %p40_p9 }
  0x47   : > { %s270_s10 = sshll.u32 %s262_s22, 4  ;;  %s1437_s15 = scalar_lea.sflag [#allocation3], %s258_s18  ;;  %s1431_s10 = int_to_ptr.vmem [resolvable:$true] %s270_s10 }
  0x48   : > { %s1136_s23 = scalar_lea.hbm %s1429_s11, 1024  ;;  %p1138_p0 = pneg %p1433_p11 }
  0x49   : > { %p1137_p12 = scmp.ne.s32.totalorder %s1429_s11, %s1136_s23  ;;  %s1141_s20 = scalar_lea.hbm %s1628_s0, 2048 }
  0x4a   : > { %p1142_p13 = scmp.lt.u32.totalorder %s1429_s11, %s1628_s0  ;;  %p1143_p6 = scmp.lt.u32.totalorder %s1141_s20, %s1136_s23 }
  0x4b   : > { %p1139_p1 = pnand %p1138_p0, %p1137_p12  ;;  %p1145_p3 = scmp.lt.u32.totalorder %s1136_s23, %s1429_s11 }
  0x4c   : > { %p1144_p10 = por %p1143_p6, %p1142_p13 }
  0x4d   : > { %p1140_p2 = pneg %p1139_p1 }
  0x4e   : > { %p1146_p7 = por %p1145_p3, %p1144_p10 }
  0x50   : > { %p1147_p9 = pnand %p1146_p7, %p1140_p2 }
  0x52   : > { %1150 = shalt.err (!%p1147_p9)
}
  0x53   : > { %s1151_s18 = scalar_lea.vmem %s1431_s10, 1024  ;;  %s1242_s19 = smov [#allocation2]  }
  0x54   : > { %p1152_p12 = scmp.ne.s32.totalorder %s1431_s10, %s1151_s18  ;;  %s1156_s14 = sshll.u32 %s1242_s19, 4  ;;  %s1157_s14 = int_to_ptr.vmem [resolvable:$false] %s1156_s14 }
  0x55   : > { %s1158_s21 = scalar_lea.vmem %s1157_s14, 2048  ;;  %p1159_p4 = scmp.lt.s32.totalorder %s1431_s10, %s1157_s14 }
  0x56   : > { %p1154_p1 = pnand %p1152_p12, %p1138_p0  ;;  %p1160_p13 = scmp.lt.s32.totalorder %s1158_s21, %s1151_s18 }
  0x58   : > { %p1155_p5 = pneg %p1154_p1  ;;  %p1161_p6 = por %p1160_p13, %p1159_p4 }
  0x5a   : > { %p1162_p10 = pnand %p1161_p6, %p1155_p5 }
  0x5c   : > { %1165 = shalt.err (!%p1162_p10)
}
  0x5d   : > { %s1647_s23 = smov 128   ;;  %282 = sbr.rel (%p1330_p8) target bundleno = 920 (0x398), region = 48 }
  0x5e   : > { %1023 = dma.hbm_to_vmem [thread:$0]  (!%p1433_p11), %s1429_s11, 1024, %s1431_s10, %s1437_s15, %s1647_s23, %s1647_s23, %s1241_s29  }
  0x5f   : > { %s1471_s20 = sand.u32 (!%p1330_p8), 1, %s1228_s25   ;;  %p1648_p4 = scmp.ne.s32.totalorder (!%p1330_p8), %s1640_s30, 0 }
  0x60   : > { %s831_s22 = sshll.u32 (!%p1330_p8), %s1471_s20, 6  ;;  %s285_s18 = scalar_lea.sflag (!%p1330_p8), [#allocation3], %s1471_s20 }
  0x61   : > { %s288_s13 = scalar_lea.vmem (!%p1330_p8), [#allocation2], %s831_s22 }
  0x64   : > { %1211 = dma.done.wait (%p1648_p4), %s285_s18, 1024  }
  0x65   : > { %1213 = vsyncadd (%p1648_p4), %s285_s18, 4294966272  ;;  %p1649_p5 = scmp.eq.s32.totalorder %s1311_s28, 0 }
  0x67   : > { %1215 = dma.done.wait (%p1649_p5), [#allocation6], 4096   ;;  %p1650_p8 = pmov %p1649_p5 }
  0x68   : > { %v1485_v0 = vld [vmem:[%s288_s13] sm:$0xff]  ;;  %v1487_v1 = vld [vmem:[%s288_s13 + $0x8] sm:$0xff]  ;;  %v1489_v2 = vld [vmem:[%s288_s13 + $0x10] sm:$0xff]  ;;  %vm374_vm0 = vcmask 1041409   ;;  %vm376_vm1 = vcmask 1042434   ;;  %vm378_vm2 = vcmask 1043459  }
  0x69   : > { %1217 = vsyncadd (%p1650_p8), [#allocation6], 4294963200  ;;  %v1491_v3 = vld [vmem:[%s288_s13 + $0x18] sm:$0xff]  ;;  %v1493_v4 = vld [vmem:[%s288_s13 + $0x20] sm:$0xff]  ;;  %v337_v6 = vadd.f32 %v1487_v1, %v1485_v0  ;;  %vm381_vm3 = vcmask 1043456   ;;  %v1243_v46 = vmov 0.0|0.0  }
  0x6a   : > { %v1495_v5 = vld [vmem:[%s288_s13 + $0x28] sm:$0xff]  ;;  %v1499_v7 = vld [vmem:[%s288_s13 + $0x30] sm:$0xff]  ;;  %v1501_v8 = vld [vmem:[%s288_s13 + $0x38] sm:$0xff]  ;;  %v344_v9 = vadd.f32 %v1491_v3, %v1489_v2  ;;  %953 = vmatprep.subr.bf16.mxu0 %v1243_v46  ;;  %977 = vmatprep.subr.bf16.mxu1 %v1243_v46  ;;  %vm1244_vm4 = vmmov 0   ;;  %s848_s21 = sshll.u32 %s1311_s28, 10  ;;  %s326_s23 = scalar_lea.vmem [#allocation8], %s831_s22 }
  0x6b   : > { %v351_v10 = vadd.f32 %v1495_v5, %v1493_v4  ;;  %v338_v11 = vrot.slane %v337_v6, 4  ;;  %v358_v12 = vadd.f32 %v1501_v8, %v1499_v7  ;;  %v454_v44 = vld [vmem:[#allocation5] sm:$0xff]  ;;  %v455_v45 = vld [vmem:[#allocation5 + $0x8] sm:$0xff]  ;;  %s729_s18 = sshll.u32 %s326_s23, 4  ;;  %s1580_s22 = scalar_lea.hbm %s1635_s7, %s848_s21  ;;  %s1582_s18 = int_to_ptr.vmem [resolvable:$true] %s729_s18 }
  0x6c   : > { %v345_v13 = vrot.slane %v344_v9, 4  ;;  %v954_v47 = vpack.c.bf16 %v455_v45, %v454_v44  ;;  %v566_v44 = vld [vmem:[#allocation7 + $0x38] sm:$0xff]  ;;  %s715_s30 = scalar_lea.sflag [#allocation4], %s1471_s20  ;;  %s1166_s9 = scalar_lea.vmem %s1582_s18, 1024 }
  0x6d   : > { %v352_v14 = vrot.slane %v351_v10, 4  ;;  %v339_v15 = vadd.f32 %v338_v11, %v337_v6  ;;  %v359_v16 = vrot.slane %v358_v12, 4  ;;  %p1167_p11 = scmp.ne.s32.totalorder %s1582_s18, %s1166_s9  ;;  %p1651_p0 = scmp.ne.s32.totalorder %s1645_s16, 0 }
  0x6e   : > { %v346_v17 = vadd.f32 %v345_v13, %v344_v9  ;;  %955 = vmatpush3.bf16.msra.mxu0 %v954_v47  ;;  %v457_v13 = vld [vmem:[#allocation5 + $0x18] sm:$0xff]  ;;  %v567_v47 = vld [vmem:[#allocation7 + $0x40] sm:$0xff]  ;;  %s1247_s29 = smov [#allocation8]  }
  0x6f   : > { %v353_v18 = vadd.f32 %v352_v14, %v351_v10  ;;  %v340_v19 = vrot.slane %v339_v15, 2  ;;  %v360_v20 = vadd.f32 %v359_v16, %v358_v12  ;;  %956 = vmatprep.subr.bf16.mxu0 %v1243_v46  ;;  %v456_v12 = vld [vmem:[#allocation5 + $0x10] sm:$0xff]  ;;  %v459_v16 = vld [vmem:[#allocation5 + $0x28] sm:$0xff]  ;;  %p1168_p2 = pnand %p1167_p11, %p1651_p0  ;;  %s1170_s11 = sshll.u32 %s1247_s29, 4  ;;  %s1171_s11 = int_to_ptr.vmem [resolvable:$false] %s1170_s11 }
  0x70   : > { %v347_v21 = vrot.slane %v346_v17, 2  ;;  %v957_v14 = vpack.c.bf16 %v457_v13, %v456_v12  ;;  %v835_v12 = vld [vmem:[%s1629_s1] ss:$0 sm:$0xff]  ;;  %s1172_s10 = scalar_lea.vmem %s1171_s11, 2048  ;;  %p1173_p7 = scmp.lt.s32.totalorder %s1582_s18, %s1171_s11 }
  0x71   : > { %v354_v22 = vrot.slane %v353_v18, 2  ;;  %v341_v23 = vadd.f32 %v340_v19, %v339_v15  ;;  %v361_v24 = vrot.slane %v360_v20, 2  ;;  %v458_v15 = vld [vmem:[#allocation5 + $0x20] sm:$0xff]  ;;  %v461_v19 = vld [vmem:[#allocation5 + $0x38] sm:$0xff]  ;;  %p1169_p3 = pneg %p1168_p2  ;;  %p1174_p9 = scmp.lt.s32.totalorder %s1172_s10, %s1166_s9 }
  0x72   : > { %v348_v25 = vadd.f32 %v347_v21, %v346_v17  ;;  %958 = vmatpush3.bf16.msra.mxu0 %v957_v14  ;;  %v960_v17 = vpack.c.bf16 %v459_v16, %v458_v15  ;;  %v1245_v21 = vmov 0.0  }
  0x73   : > { %v355_v26 = vadd.f32 %v354_v22, %v353_v18  ;;  %v342_v27 = vrot.slane %v341_v23, 1  ;;  %v362_v28 = vadd.f32 %v361_v24, %v360_v20  ;;  %959 = vmatprep.subr.bf16.mxu0 %v1243_v46  ;;  %v460_v18 = vld [vmem:[#allocation5 + $0x30] sm:$0xff]  ;;  %915 = vmatprep.mubr.msk.f32.mxu0 %vm1244_vm4, %v1245_v21  ;;  %v462_v22 = vld [vmem:[#allocation5 + $0x40] sm:$0xff]  ;;  %p1175_p12 = por %p1174_p9, %p1173_p7 }
  0x74   : > { %v349_v29 = vrot.slane %v348_v25, 1  ;;  %v963_v20 = vpack.c.bf16 %v461_v19, %v460_v18  ;;  %950 = vmatprep.mubr.msk.f32.mxu1 %vm1244_vm4, %v1245_v21  ;;  %v836_v19 = vld [vmem:[%s1630_s2] ss:$0 sm:$0xff] }
  0x75   : > { %v356_v30 = vrot.slane %v355_v26, 1  ;;  %v343_v31 = vadd.f32 %v342_v27, %v341_v23  ;;  %v363_v32 = vrot.slane %v362_v28, 1  ;;  %v463_v23 = vld [vmem:[#allocation5 + $0x48] sm:$0xff]  ;;  %p1176_p1 = pnand %p1175_p12, %p1169_p3 }
  0x76   : > { %v350_v33 = vadd.f32 %v349_v29, %v348_v25  ;;  %961 = vmatpush3.bf16.msra.mxu0 %v960_v17  ;;  %v966_v24 = vpack.c.bf16 %v463_v23, %v462_v22  ;;  %v464_v25 = vld [vmem:[#allocation5 + $0x50] sm:$0xff]  ;;  %v467_v29 = vld [vmem:[#allocation5 + $0x68] sm:$0xff] }
  0x77   : > { %v357_v34 = vadd.f32 %v356_v30, %v355_v26  ;;  %v364_v35 = vadd.f32 %v363_v32, %v362_v28  ;;  %v366_v36 = vmul.f32 0.0625, %v343_v31  ;;  %962 = vmatprep.subr.bf16.mxu0 %v1243_v46  ;;  %v465_v26 = vld [vmem:[#allocation5 + $0x58] sm:$0xff]  ;;  %v466_v28 = vld [vmem:[#allocation5 + $0x60] sm:$0xff]  ;;  %v468_v31 = vld [vmem:[#allocation5 + $0x70] sm:$0xff] }
  0x78   : > { %v367_v37 = vmul.f32 0.0625, %v350_v33  ;;  %v969_v27 = vpack.c.bf16 %v465_v26, %v464_v25  ;;  %v972_v30 = vpack.c.bf16 %v467_v29, %v466_v28  ;;  %v469_v32 = vld [vmem:[#allocation5 + $0x78] sm:$0xff]  ;;  %v573_v26 = vld [vmem:[#allocation7 + $0x70] sm:$0xff]  ;;  %v837_v29 = vld [vmem:[%s1632_s4] ss:$0 sm:$0xff] }
  0x79   : > { %v368_v38 = vmul.f32 0.0625, %v357_v34  ;;  %v369_v39 = vmul.f32 0.0625, %v364_v35  ;;  %v975_v33 = vpack.c.bf16 %v469_v32, %v468_v31  ;;  %v559_v34 = vld [vmem:[#allocation7] sm:$0xff]  ;;  %v560_v35 = vld [vmem:[#allocation7 + $0x8] sm:$0xff] }
  0x7a   : > { %v375_v40 = vsel %vm374_vm0, %v367_v37, %v366_v36  ;;  %964 = vmatpush3.bf16.msra.mxu0 %v963_v20 }
  0x7b   : > { %v377_v41 = vsel %vm376_vm1, %v368_v38, %v375_v40  ;;  %965 = vmatprep.subr.bf16.mxu0 %v1243_v46  ;;  %v563_v40 = vld [vmem:[#allocation7 + $0x20] sm:$0xff] }
  0x7c   : > { %v379_v42 = vsel %vm378_vm2, %v369_v39, %v377_v41  ;;  %v564_v41 = vld [vmem:[#allocation7 + $0x28] sm:$0xff] }
  0x7d   : > { %v382_v43 = vsel %vm381_vm3, %v379_v42, 0.0  ;;  %v984_v42 = vpack.c.bf16 %v564_v41, %v563_v40  ;;  %v657_v40 = vlaneseq }
  0x7e   : > { %383 = vadd.xlane.f32.xlu0 %v382_v43  ;;  %967 = vmatpush3.bf16.msra.mxu0 %v966_v24  ;;  %v565_v43 = vld [vmem:[#allocation7 + $0x30] sm:$0xff] }
  0x7f   : > { %968 = vmatprep.subr.bf16.mxu0 %v1243_v46  ;;  %v987_v45 = vpack.c.bf16 %v566_v44, %v565_v43 }
  0x82   : > { %970 = vmatpush3.bf16.msra.mxu0 %v969_v27  ;;  %v574_v27 = vld [vmem:[#allocation7 + $0x78] sm:$0xff] }
  0x83   : > { %971 = vmatprep.subr.bf16.mxu0 %v1243_v46  ;;  %v999_v28 = vpack.c.bf16 %v574_v27, %v573_v26 }
  0x86   : > { %973 = vmatpush3.bf16.msra.mxu0 %v972_v30 }
  0x87   : > { %974 = vmatprep.subr.bf16.mxu0 %v1243_v46 }
  0x8a   : > { %976 = vmatpush3.bf16.msra.mxu0 %v975_v33 }
 0x10b   : > { %v384_v48 = vpop.xlane.xlu0 %383 }
 0x10c   : > { %v386_v49 = vmul.f32 0.0078125, %v384_v48  ;;  %v568_v48 = vld [vmem:[#allocation7 + $0x48] sm:$0xff] }
 0x10e   : > { %v388_v50 = vrot.slane %v386_v49, 1  ;;  %v389_v51 = vrot.slane %v386_v49, 2  ;;  %v390_v52 = vrot.slane %v386_v49, 3  ;;  %v1516_v53 = vsub.f32 %v366_v36, %v386_v49  ;;  %v561_v36 = vld [vmem:[#allocation7 + $0x10] sm:$0xff] }
 0x10f   : > { %v990_v49 = vpack.c.bf16 %v568_v48, %v567_v47 }
 0x110   : > { %v1518_v54 = vsub.f32 %v367_v37, %v388_v50  ;;  %v1520_v55 = vsub.f32 %v368_v38, %v389_v51  ;;  %v1522_v56 = vsub.f32 %v369_v39, %v390_v52  ;;  %v399_v60 = vmul.f32 %v1516_v53, %v1516_v53  ;;  %v562_v38 = vld [vmem:[#allocation7 + $0x18] sm:$0xff]  ;;  %v569_v50 = vld [vmem:[#allocation7 + $0x50] sm:$0xff] }
 0x111   : > { %v978_v37 = vpack.c.bf16 %v560_v35, %v559_v34  ;;  %v981_v39 = vpack.c.bf16 %v562_v38, %v561_v36  ;;  %v570_v51 = vld [vmem:[#allocation7 + $0x58] sm:$0xff]  ;;  %v838_v34 = vld [vmem:[%s1634_s6] ss:$0 sm:$0xff]  ;;  %v1246_v38 = vmov 1966171168  }
 0x112   : > { %v400_v57 = vmul.f32 %v1518_v54, %v1518_v54  ;;  %v401_v58 = vmul.f32 %v1520_v55, %v1520_v55  ;;  %v402_v59 = vmul.f32 %v1522_v56, %v1522_v56  ;;  %v993_v52 = vpack.c.bf16 %v570_v51, %v569_v50 }
 0x113   : > { %979 = vmatpush3.bf16.msra.mxu1 %v978_v37 }
 0x114   : > { %v407_v61 = vrot.slane %v400_v57, 7  ;;  %v409_v62 = vrot.slane %v401_v58, 6  ;;  %v411_v6 = vrot.slane %v402_v59, 5  ;;  %980 = vmatprep.subr.bf16.mxu1 %v1243_v46  ;;  %v571_v57 = vld [vmem:[#allocation7 + $0x60] sm:$0xff]  ;;  %v572_v58 = vld [vmem:[#allocation7 + $0x68] sm:$0xff] }
 0x115   : > { %v996_v59 = vpack.c.bf16 %v572_v58, %v571_v57 }
 0x116   : > { %v408_v63 = vsel %vm374_vm0, %v407_v61, %v399_v60 }
 0x117   : > { %v410_v9 = vsel %vm376_vm1, %v409_v62, %v408_v63  ;;  %982 = vmatpush3.bf16.msra.mxu1 %v981_v39  ;;  %v655_v39 = vunpack.c.l.s4 %v1246_v38 }
 0x118   : > { %v412_v10 = vsel %vm378_vm2, %v411_v6, %v410_v9  ;;  %983 = vmatprep.subr.bf16.mxu1 %v1243_v46 }
 0x119   : > { %v414_v11 = vsel %vm381_vm3, %v412_v10, 0.0  ;;  %v656_v41 = vunpack.c.0.s8 %v655_v39 }
 0x11a   : > { %415 = vadd.xlane.f32.xlu0 %v414_v11 }
 0x11b   : > { %985 = vmatpush3.bf16.msra.mxu1 %v984_v42  ;;  %v658_v42 = vshrl.u32 %v657_v40, 7 }
 0x11c   : > { %986 = vmatprep.subr.bf16.mxu1 %v1243_v46 }
 0x11d   : > { %v659_v43 = vsub.s32 %v656_v41, %v658_v42  ;;  %v680_v47 = vsub.s32 0, %v658_v42 }
 0x11f   : > { %988 = vmatpush3.bf16.msra.mxu1 %v987_v45 }
 0x120   : > { %989 = vmatprep.subr.bf16.mxu1 %v1243_v46 }
 0x123   : > { %991 = vmatpush3.bf16.msra.mxu1 %v990_v49 }
 0x124   : > { %992 = vmatprep.subr.bf16.mxu1 %v1243_v46 }
 0x127   : > { %994 = vmatpush3.bf16.msra.mxu1 %v993_v52 }
 0x128   : > { %995 = vmatprep.subr.bf16.mxu1 %v1243_v46 }
 0x12b   : > { %997 = vmatpush3.bf16.msra.mxu1 %v996_v59 }
 0x12c   : > { %998 = vmatprep.subr.bf16.mxu1 %v1243_v46 }
 0x12f   : > { %1000 = vmatpush3.bf16.msra.mxu1 %v999_v28 }
 0x1a7   : > { %v416_v60 = vpop.xlane.xlu0 %415 }
 0x1a8   : > { %v417_v61 = vmul.f32 0.0078125, %v416_v60 }
 0x1aa   : > { %v418_v62 = vadd.f32 1e-05, %v417_v61 }
 0x1ac   : > { %1076 = vrsqrt.f32 %v418_v62 }
 0x1b6   : > { %v1077_v63 = vpop.eup %1076 }
 0x1b7   : > { %v421_v6 = vrot.slane %v1077_v63, 1  ;;  %v422_v9 = vrot.slane %v1077_v63, 2  ;;  %v423_v10 = vrot.slane %v1077_v63, 3  ;;  %v428_v11 = vmul.f32 %v1077_v63, %v1516_v53 }
 0x1b9   : > { %v429_v13 = vmul.f32 %v421_v6, %v1518_v54  ;;  %v430_v14 = vmul.f32 %v422_v9, %v1520_v55  ;;  %v431_v46 = vmul.f32 %v423_v10, %v1522_v56  ;;  %v439_v15 = vmul.f32 %v835_v12, %v428_v11 }
 0x1bb   : > { %v440_v16 = vmul.f32 %v835_v12, %v429_v13  ;;  %v441_v17 = vmul.f32 %v835_v12, %v430_v14  ;;  %v442_v18 = vmul.f32 %v835_v12, %v431_v46  ;;  %v450_v22 = vadd.f32 %v836_v19, %v439_v15 }
 0x1bd   : > { %v451_v20 = vadd.f32 %v836_v19, %v440_v16  ;;  %v452_v53 = vadd.f32 %v836_v19, %v441_v17  ;;  %v453_v21 = vadd.f32 %v836_v19, %v442_v18 }
 0x1bf   : > { %v481_v23 = vrot.slane %v451_v20, 7  ;;  %v483_v24 = vrot.slane %v452_v53, 6  ;;  %v485_v25 = vrot.slane %v453_v21, 5 }
 0x1c1   : > { %v482_v54 = vsel %vm374_vm0, %v481_v23, %v450_v22 }
 0x1c2   : > { %v484_v55 = vsel %vm376_vm1, %v483_v24, %v482_v54 }
 0x1c3   : > { %v486_v56 = vsel %vm378_vm2, %v485_v25, %v484_v55 }
 0x1c4   : > { %916 = vmatmul.mubr.f32.vlgmr.msra.gmra.mrb[0].mxu0 %v486_v56 }
 0x297   : > { %v554_v30 = vpop.f32.mrb[0].mxu0 }
 0x298   : > { %v555_v31 = vadd.f32 %v837_v29, %v554_v30  ;;  %v917_v32 = vpop.f32.mrb[1].mxu0 }
 0x29a   : > { %v558_v33 = vmax.f32 %v555_v31, 0.0 }
 0x29c   : > { %951 = vmatmul.mubr.f32.vlgmr.msra.gmra.mrb[0].mxu1 %v558_v33 }
 0x36f   : > { %v648_v35 = vpop.f32.mrb[0].mxu1 }
 0x370   : > { %v649_v36 = vadd.f32 %v838_v34, %v648_v35  ;;  %v952_v37 = vpop.f32.mrb[1].mxu1 }
 0x372   : > { %1078 = vtanh.f32 %v649_v36 }
 0x37c   : > { %v1079_v44 = vpop.eup %1078 }
 0x37d   : > { %v660_v45 = vrot.slane %v1079_v44, %v659_v43 }
 0x37f   : > { %v661_v48 = vcombine.high %v660_v45, %v660_v45  ;;  %v668_v49 = vrot.slane %v660_v45, %v659_v43 }
 0x381   : > { %v675_v50 = vrot.slane %v661_v48, %v659_v43  ;;  %v676_v51 = vcombine.high %v668_v49, %v668_v49  ;;  %v681_v52 = vrot.slane %v668_v49, %v680_v47 }
 0x383   : > { %v677_v57 = vcombine.high %v675_v50, %v675_v50  ;;  %v685_v58 = vrot.slane %v675_v50, %v680_v47  ;;  %v689_v59 = vrot.slane %v676_v51, %v680_v47  ;;  %v698_v60 = vmul.f32 %v681_v52, %v1485_v0 }
 0x384   : > { %v699_v61 = vmul.f32 %v681_v52, %v1487_v1 }
 0x385   : > { %v693_v62 = vrot.slane %v677_v57, %v680_v47  ;;  %v700_v63 = vmul.f32 %v685_v58, %v1489_v2  ;;  %v701_v6 = vmul.f32 %v685_v58, %v1491_v3  ;;  %v702_v9 = vmul.f32 %v689_v59, %v1493_v4  ;;  %706 = vst [vmem:[%s326_s23] sm:$0xff] %v698_v60 }
 0x386   : > { %v703_v10 = vmul.f32 %v689_v59, %v1495_v5  ;;  %707 = vst [vmem:[%s326_s23 + $0x8] sm:$0xff] %v699_v61 }
 0x387   : > { %v704_v0 = vmul.f32 %v693_v62, %v1499_v7  ;;  %v705_v1 = vmul.f32 %v693_v62, %v1501_v8  ;;  %708 = vst [vmem:[%s326_s23 + $0x10] sm:$0xff] %v700_v63  ;;  %709 = vst [vmem:[%s326_s23 + $0x18] sm:$0xff] %v701_v6 }
 0x388   : > { %710 = vst [vmem:[%s326_s23 + $0x20] sm:$0xff] %v702_v9  ;;  %711 = vst [vmem:[%s326_s23 + $0x28] sm:$0xff] %v703_v10 }
 0x389   : > { %712 = vst [vmem:[%s326_s23 + $0x30] sm:$0xff] %v704_v0  ;;  %713 = vst [vmem:[%s326_s23 + $0x38] sm:$0xff] %v705_v1 }
 0x38a   : > { %1179 = shalt.err (!%p1176_p1)
}
 0x38b   : > { %s1180_s15 = scalar_lea.hbm %s1580_s22, 1024  ;;  %s1184_s21 = scalar_lea.hbm %s1635_s7, 2048 }
 0x38c   : > { %p1181_p13 = scmp.ne.s32.totalorder %s1580_s22, %s1180_s15  ;;  %p1185_p4 = scmp.lt.u32.totalorder %s1580_s22, %s1635_s7 }
 0x38d   : > { %p1186_p5 = scmp.lt.u32.totalorder %s1184_s21, %s1180_s15  ;;  %p1188_p11 = scmp.lt.u32.totalorder %s1180_s15, %s1580_s22 }
 0x38e   : > { %p1182_p6 = pnand %p1181_p13, %p1651_p0 }
 0x38f   : > { %p1187_p8 = por %p1186_p5, %p1185_p4 }
 0x390   : > { %p1183_p10 = pneg %p1182_p6 }
 0x391   : > { %p1189_p2 = por %p1188_p11, %p1187_p8 }
 0x393   : > { %p1190_p3 = pnand %p1189_p2, %p1183_p10 }
 0x395   : > { %1193 = shalt.err (!%p1190_p3)
}
 0x396   : > { %s1248_s28 = smov 128   ;;  %s1249_s9 = smov 8  }
 0x397   : > { %1011 = dma.vmem_to_hbm [thread:$0]  (%p1651_p0), %s1582_s18, 1024, %s1580_s22, %s715_s30, %s1248_s28, %s1248_s28, %s1249_s9  }
 0x398 PF: > { %s744_s29 = sand.u32 1, %s1224_s24   ;;  %p1652_p7 = scmp.ne.s32.totalorder %s1641_s8, 0 }
 0x399   : > { %p1653_p9 = scmp.ge.s32.totalorder %s1236_s27, 2  ;;  %s745_s11 = scalar_lea.sflag [#allocation4], %s744_s29 }
 0x39b   : > { %p1025_p12 = pnand %p1653_p9, %p1652_p7 }
 0x39d   : > { %1219 = dma.done.wait (!%p1025_p12), %s745_s11, 1024  }
 0x39e   : > { %1221 = vsyncadd (!%p1025_p12), %s745_s11, 4294966272  ;;  %p21_p1 = scmp.ge.s32.totalorder %s1406_s12, 4   ;;  %s1654_s24 = smov %s1228_s25 }
 0x39f   : > { %s1655_s25 = smov %s1232_s26  ;;  %s1656_s26 = smov %s1422_s17 }
 0x3a0   : > { %s1657_s27 = smov %s1406_s12  ;;  %23 = sbr.rel (!%p21_p1) target bundleno = 6 (0x6), region = 101 }
 0x3a7   :  { %750 = vsyncpa [#allocation3], 1 }
 0x3a8   :  { %752 = vsyncpa [#allocation3 + $0x1], 1 }
 0x3a9   :  { %753 = vsyncpa [#allocation6], 1 }
 0x3aa   :  { %754 = vsyncpa [#allocation4], 1 }
 0x3ab   :  { %756 = vsyncpa [#allocation4 + $0x1], 1 }

</bundles_post_ra>
